<compile_context>
chip_gen: v6e
topology: v6e:2x2x1
jax: 0.10.0
libtpu: 0.0.40
codegen_flags: <defaults>
</compile_context>

<pallas_src>
import functools

import jax
import jax.numpy as jnp
from jax import lax
from jax.experimental import pallas as pl
from jax.experimental.pallas import tpu as pltpu


def _stats_kernel(x_ref, w_attn_ref, stats_ref, *, cu):
    """Per-(batch, spatial-tile) partial BN statistics of the pre-BN tensor."""
    x = x_ref[...].astype(jnp.float32)          # (C, tile_hw), channels in sublanes
    x1 = x[:cu, :]                              # untouched channels
    x2 = x[cu:, :]                              # conv channels

    # weight = Hardsigmoid(conv_attn(x1)); 1x1 conv == (n_head, cu) @ (cu, tile_hw)
    attn = jnp.dot(w_attn_ref[...], x1, preferred_element_type=jnp.float32)
    wgt = jnp.clip(attn * (1.0 / 6.0) + 0.5, 0.0, 1.0)   # PyTorch Hardsigmoid
    x1w = x1 * wgt                                        # n_head == 1 (or == cu)

    # Per-channel partial sums (lane reductions); write halves in place, no concat.
    stats_ref[:cu, 0:1] = jnp.sum(x1w, axis=1, keepdims=True)
    stats_ref[cu:, 0:1] = jnp.sum(x2, axis=1, keepdims=True)
    stats_ref[:cu, 1:2] = jnp.sum(x1w * x1w, axis=1, keepdims=True)
    stats_ref[cu:, 1:2] = jnp.sum(x2 * x2, axis=1, keepdims=True)


def _norm_kernel(x_ref, w_attn_ref, w_conv_ref, scale_ref, bias_ref, o_ref, *, cu):
    """Apply attn weight, BN (precomputed scale/bias) and the 1x1 conv; write output."""
    x = x_ref[...].astype(jnp.float32)          # (C, tile_hw)
    x1 = x[:cu, :]
    x2 = x[cu:, :]

    attn = jnp.dot(w_attn_ref[...], x1, preferred_element_type=jnp.float32)
    wgt = jnp.clip(attn * (1.0 / 6.0) + 0.5, 0.0, 1.0)

    # BN folded into per-channel scale/bias, broadcast over lanes.
    x1n = (x1 * wgt) * scale_ref[:cu, :] + bias_ref[:cu, :]
    x2n = x2 * scale_ref[cu:, :] + bias_ref[cu:, :]

    # 1x1 conv on the conv half: (cc, cc) @ (cc, tile_hw) -> wide-N MXU matmul.
    x2o = jnp.dot(w_conv_ref[...], x2n, preferred_element_type=jnp.float32)

    # Write the two channel halves of the output block in place (no concatenate).
    o_ref[:cu, :] = x1n.astype(o_ref.dtype)
    o_ref[cu:, :] = x2o.astype(o_ref.dtype)


def partial_spatial_attn_layer_reverse(x_nchw, w_attn, w_conv, gamma, beta,
                                       *, eps=1e-5, max_tile_hw=2048):
    b, c, h, w = x_nchw.shape
    n_head, cu = w_attn.shape
    cc = c - cu
    assert w_conv.shape == (cc, cc)
    # x1 * weight broadcasting (matching the PyTorch module) only works for
    # n_head == 1 (broadcast) or n_head == dim_untouched (elementwise).
    assert n_head in (1, cu), "n_head must be 1 or dim_untouched"

    hw = h * w
    out_dtype = x_nchw.dtype

    # Channels-major slab: (B, C, H*W). Pure reshape of NCHW -> no transpose,
    # no extra HBM pass; spatial goes into the (lane) minor dimension.
    x3 = x_nchw.reshape(b, c, hw)

    # Tile the spatial axis into lane-dense blocks (multiple of 128), capped by
    # max_tile_hw so per-step work is large vs. the ~0.35us grid-step overhead.
    hw128 = ((hw + 127) // 128) * 128
    n_t = max(1, -(-hw128 // max_tile_hw))                 # cdiv
    tile_hw = ((-(-hw128 // n_t) + 127) // 128) * 128
    hw_pad = n_t * tile_hw
    if hw_pad != hw:
        # zero columns contribute 0 to sum / sum-of-squares (hardsigmoid(0)*0 == 0)
        x3 = jnp.pad(x3, ((0, 0), (0, 0), (0, hw_pad - hw)))

    w_attn_f = w_attn.astype(jnp.float32)                  # (n_head, cu)
    w_conv_f = w_conv.astype(jnp.float32)                  # (cc, cc)

    # ---- pass 1: partial BN statistics (per batch / spatial tile) ----------
    stats = pl.pallas_call(
        functools.partial(_stats_kernel, cu=cu),
        out_shape=jax.ShapeDtypeStruct((b, n_t, c, 2), jnp.float32),
        grid_spec=pltpu.PrefetchScalarGridSpec(
            num_scalar_prefetch=0,
            grid=(b, n_t),
            in_specs=[
                pl.BlockSpec((None, c, tile_hw), lambda bi, ti: (bi, 0, ti)),
                pl.BlockSpec((n_head, cu), lambda bi, ti: (0, 0)),
            ],
            out_specs=pl.BlockSpec((None, None, c, 2),
                                   lambda bi, ti: (bi, ti, 0, 0)),
        ),
        compiler_params=pltpu.CompilerParams(
            dimension_semantics=("parallel", "parallel"),
            vmem_limit_bytes=32 * 1024 * 1024),
    )(x3, w_attn_f)

    # Hierarchical (two-level) reduction of the partial stats in f32.
    count = float(b * hw)
    sums = jnp.sum(stats[..., 0], axis=(0, 1))             # (C,)
    sqs = jnp.sum(stats[..., 1], axis=(0, 1))              # (C,)
    mean = sums / count
    var = jnp.maximum(sqs / count - mean * mean, 0.0)      # biased var (BN training)
    scale = gamma.astype(jnp.float32) * lax.rsqrt(var + eps)
    bias = beta.astype(jnp.float32) - mean * scale
    scale = scale.reshape(c, 1)
    bias = bias.reshape(c, 1)

    # ---- pass 2: normalize + 1x1 conv + write output ------------------------
    out = pl.pallas_call(
        functools.partial(_norm_kernel, cu=cu),
        out_shape=jax.ShapeDtypeStruct((b, c, hw_pad), out_dtype),
        grid_spec=pltpu.PrefetchScalarGridSpec(
            num_scalar_prefetch=0,
            grid=(b, n_t),
            in_specs=[
                pl.BlockSpec((None, c, tile_hw), lambda bi, ti: (bi, 0, ti)),
                pl.BlockSpec((n_head, cu), lambda bi, ti: (0, 0)),
                pl.BlockSpec((cc, cc), lambda bi, ti: (0, 0)),
                pl.BlockSpec((c, 1), lambda bi, ti: (0, 0)),
                pl.BlockSpec((c, 1), lambda bi, ti: (0, 0)),
            ],
            out_specs=pl.BlockSpec((None, c, tile_hw), lambda bi, ti: (bi, 0, ti)),
        ),
        compiler_params=pltpu.CompilerParams(
            dimension_semantics=("parallel", "parallel"),
            vmem_limit_bytes=32 * 1024 * 1024),
    )(x3, w_attn_f, w_conv_f, scale, bias)

    if hw_pad != hw:
        out = out[:, :, :hw]
    return out.reshape(b, c, h, w)


def _reference(x, w_attn, w_conv, gamma, beta, eps=1e-5):
    """Pure-JAX replica of the PyTorch forward (training-mode BatchNorm)."""
    n_head, cu = w_attn.shape
    x1, x2 = x[:, :cu], x[:, cu:]
    attn = jnp.einsum('nchw,oc->nohw', x1, w_attn)
    wgt = jnp.clip(attn / 6.0 + 0.5, 0.0, 1.0)
    x1 = x1 * wgt

    def bn(v, g, bt):
        mean = jnp.mean(v, axis=(0, 2, 3), keepdims=True)
        var = jnp.var(v, axis=(0, 2, 3), keepdims=True)
        return (v - mean) * lax.rsqrt(var + eps) * g.reshape(1, -1, 1, 1) \
               + bt.reshape(1, -1, 1, 1)

    x1 = bn(x1, gamma[:cu], beta[:cu])
    x2 = bn(x2, gamma[cu:], beta[cu:])
    x2 = jnp.einsum('nchw,oc->nohw', x2, w_conv)
    return jnp.concatenate([x1, x2], axis=1)


if __name__ == "__main__":
    key = jax.random.PRNGKey(0)
    k_x, k_attn, k_conv = jax.random.split(key, 3)

    dim, n_head, partial_ratio = 8, 1, 0.5          # n_head=1 so x1*weight broadcasts
    dim_conv = int(partial_ratio * dim)             # = 4
    dim_untouched = dim - dim_conv                  # = 4
    b, h, w = 2, 16, 16

    x = jax.random.normal(k_x, (b, dim, h, w), dtype=jnp.float32)
    # Deterministic synthetic parameters (module __init__ shapes):
    w_attn = 0.3 * jax.random.normal(k_attn, (n_head, dim_untouched), jnp.float32)
    w_conv = 0.3 * jax.random.normal(k_conv, (dim_conv, dim_conv), jnp.float32)
    gamma = jnp.ones((dim,), jnp.float32)           # [norm.weight, norm2.weight]
    beta = jnp.zeros((dim,), jnp.float32)           # [norm.bias,  norm2.bias]

    out = partial_spatial_attn_layer_reverse(x, w_attn, w_conv, gamma, beta)
    out = jax.block_until_ready(out)

    ref = _reference(x, w_attn, w_conv, gamma, beta)
    assert out.shape == (b, dim, h, w)
    assert jnp.allclose(out, ref, atol=1e-4, rtol=1e-4), \
        float(jnp.max(jnp.abs(out - ref)))
    print("KERNEL_OK")
</pallas_src>

<mosaic_0001>
module attributes {stable_mosaic.version = 11 : i64} {
  func.func @_stats_kernel(%arg0: i32, %arg1: i32, %arg2: memref<1x8x256xf32, #tpu.memory_space<vmem>>, %arg3: memref<1x4xf32, #tpu.memory_space<vmem>>, %arg4: memref<1x1x8x2xf32, #tpu.memory_space<vmem>>) attributes {dimension_semantics = [#tpu.dimension_semantics<parallel>, #tpu.dimension_semantics<parallel>], iteration_bounds = array<i64: 2, 1>, scalar_prefetch = 0 : i64, scratch_operands = 0 : i64, tpu.core_type = #tpu.core_type<tc>, window_params = [{transform_indices = @transform_0, window_bounds = array<i64: 1, 8, 256>}, {pipeline_mode = #tpu.pipeline_mode<synchronous>, transform_indices = @transform_1, window_bounds = array<i64: 1, 4>}, {transform_indices = @transform_2, window_bounds = array<i64: 1, 1, 8, 2>}]} {
    %c0 = arith.constant 0 : index
    %c0_0 = arith.constant 0 : index
    %c0_1 = arith.constant 0 : index
    %0 = vector.load %arg2[%c0, %c0_0, %c0_1] : memref<1x8x256xf32, #tpu.memory_space<vmem>>, vector<1x8x256xf32>
    %1 = vector.shape_cast %0 : vector<1x8x256xf32> to vector<8x256xf32>
    %2 = vector.extract_strided_slice %1 {offsets = [0, 0], sizes = [4, 256], strides = [1, 1]} : vector<8x256xf32> to vector<4x256xf32>
    %3 = vector.extract_strided_slice %1 {offsets = [4, 0], sizes = [4, 256], strides = [1, 1]} : vector<8x256xf32> to vector<4x256xf32>
    %c0_2 = arith.constant 0 : index
    %c0_3 = arith.constant 0 : index
    %4 = vector.load %arg3[%c0_2, %c0_3] : memref<1x4xf32, #tpu.memory_space<vmem>>, vector<1x4xf32>
    %cst = arith.constant dense<0.000000e+00> : vector<1x256xf32>
    %5 = tpu.matmul %4, %2, %cst {dimension_numbers = #tpu.dot_dimension_numbers<[1], [0], [0], [1], [0, 0, 1, 1], [], []>} : vector<1x4xf32>, vector<4x256xf32>, vector<1x256xf32> -> vector<1x256xf32>
    %cst_4 = arith.constant 0.166666672 : f32
    %6 = vector.broadcast %cst_4 : f32 to vector<1x256xf32>
    %7 = arith.mulf %5, %6 : vector<1x256xf32>
    %cst_5 = arith.constant 5.000000e-01 : f32
    %8 = vector.broadcast %cst_5 : f32 to vector<1x256xf32>
    %9 = arith.addf %7, %8 : vector<1x256xf32>
    %cst_6 = arith.constant 0.000000e+00 : f32
    %cst_7 = arith.constant 1.000000e+00 : f32
    %10 = vector.broadcast %cst_6 : f32 to vector<1x256xf32>
    %11 = arith.maximumf %10, %9 : vector<1x256xf32>
    %12 = vector.broadcast %cst_7 : f32 to vector<1x256xf32>
    %13 = arith.minimumf %12, %11 : vector<1x256xf32>
    %14 = vector.broadcast %13 : vector<1x256xf32> to vector<4x256xf32>
    %15 = arith.mulf %2, %14 : vector<4x256xf32>
    %cst_8 = arith.constant dense<0.000000e+00> : vector<4xf32>
    %16 = vector.multi_reduction <add>, %15, %cst_8 [1] : vector<4x256xf32> to vector<4xf32>
    %17 = vector.shape_cast %16 : vector<4xf32> to vector<4x1xf32>
    %c0_9 = arith.constant 0 : index
    %c0_10 = arith.constant 0 : index
    %c0_11 = arith.constant 0 : index
    %c0_12 = arith.constant 0 : index
    %18 = vector.load %arg4[%c0_9, %c0_10, %c0_11, %c0_12] : memref<1x1x8x2xf32, #tpu.memory_space<vmem>>, vector<1x1x4x1xf32>
    %19 = vector.shape_cast %18 : vector<1x1x4x1xf32> to vector<4x1xf32>
    %20 = vector.shape_cast %17 : vector<4x1xf32> to vector<1x1x4x1xf32>
    tpu.vector_store %arg4[%c0_9, %c0_10, %c0_11, %c0_12], %20 {strides = array<i32>} : memref<1x1x8x2xf32, #tpu.memory_space<vmem>>, vector<1x1x4x1xf32>,
    %cst_13 = arith.constant dense<0.000000e+00> : vector<4xf32>
    %21 = vector.multi_reduction <add>, %3, %cst_13 [1] : vector<4x256xf32> to vector<4xf32>
    %22 = vector.shape_cast %21 : vector<4xf32> to vector<4x1xf32>
    %c0_14 = arith.constant 0 : index
    %c0_15 = arith.constant 0 : index
    %c4 = arith.constant 4 : index
    %c0_16 = arith.constant 0 : index
    %23 = vector.load %arg4[%c0_14, %c0_15, %c4, %c0_16] : memref<1x1x8x2xf32, #tpu.memory_space<vmem>>, vector<1x1x4x1xf32>
    %24 = vector.shape_cast %23 : vector<1x1x4x1xf32> to vector<4x1xf32>
    %25 = vector.shape_cast %22 : vector<4x1xf32> to vector<1x1x4x1xf32>
    tpu.vector_store %arg4[%c0_14, %c0_15, %c4, %c0_16], %25 {strides = array<i32>} : memref<1x1x8x2xf32, #tpu.memory_space<vmem>>, vector<1x1x4x1xf32>,
    %26 = arith.mulf %15, %15 : vector<4x256xf32>
    %cst_17 = arith.constant dense<0.000000e+00> : vector<4xf32>
    %27 = vector.multi_reduction <add>, %26, %cst_17 [1] : vector<4x256xf32> to vector<4xf32>
    %28 = vector.shape_cast %27 : vector<4xf32> to vector<4x1xf32>
    %c0_18 = arith.constant 0 : index
    %c0_19 = arith.constant 0 : index
    %c0_20 = arith.constant 0 : index
    %c1 = arith.constant 1 : index
    %29 = vector.load %arg4[%c0_18, %c0_19, %c0_20, %c1] : memref<1x1x8x2xf32, #tpu.memory_space<vmem>>, vector<1x1x4x1xf32>
    %30 = vector.shape_cast %29 : vector<1x1x4x1xf32> to vector<4x1xf32>
    %31 = vector.shape_cast %28 : vector<4x1xf32> to vector<1x1x4x1xf32>
    tpu.vector_store %arg4[%c0_18, %c0_19, %c0_20, %c1], %31 {strides = array<i32>} : memref<1x1x8x2xf32, #tpu.memory_space<vmem>>, vector<1x1x4x1xf32>,
    %32 = arith.mulf %3, %3 : vector<4x256xf32>
    %cst_21 = arith.constant dense<0.000000e+00> : vector<4xf32>
    %33 = vector.multi_reduction <add>, %32, %cst_21 [1] : vector<4x256xf32> to vector<4xf32>
    %34 = vector.shape_cast %33 : vector<4xf32> to vector<4x1xf32>
    %c0_22 = arith.constant 0 : index
    %c0_23 = arith.constant 0 : index
    %c4_24 = arith.constant 4 : index
    %c1_25 = arith.constant 1 : index
    %35 = vector.load %arg4[%c0_22, %c0_23, %c4_24, %c1_25] : memref<1x1x8x2xf32, #tpu.memory_space<vmem>>, vector<1x1x4x1xf32>
    %36 = vector.shape_cast %35 : vector<1x1x4x1xf32> to vector<4x1xf32>
    %37 = vector.shape_cast %34 : vector<4x1xf32> to vector<1x1x4x1xf32>
    tpu.vector_store %arg4[%c0_22, %c0_23, %c4_24, %c1_25], %37 {strides = array<i32>} : memref<1x1x8x2xf32, #tpu.memory_space<vmem>>, vector<1x1x4x1xf32>,
    return
  }
  func.func @transform_0(%arg0: i32, %arg1: i32) -> (i32, i32, i32) {
    %c0_i32 = arith.constant 0 : i32
    %c0_i32_0 = arith.constant 0 : i32
    return %arg0, %c0_i32, %arg1 : i32, i32, i32
  }
  func.func @transform_1(%arg0: i32, %arg1: i32) -> (i32, i32) {
    %c0_i32 = arith.constant 0 : i32
    %c0_i32_0 = arith.constant 0 : i32
    %c0_i32_1 = arith.constant 0 : i32
    return %c0_i32, %c0_i32_0 : i32, i32
  }
  func.func @transform_2(%arg0: i32, %arg1: i32) -> (i32, i32, i32, i32) {
    %c0_i32 = arith.constant 0 : i32
    %c0_i32_0 = arith.constant 0 : i32
    %c0_i32_1 = arith.constant 0 : i32
    return %arg0, %arg1, %c0_i32, %c0_i32_0 : i32, i32, i32, i32
  }
}

</mosaic_0001>

<bundles_post_ra>
// kernel: tpu_custom_call.1
= control target key start
LH: loop header
LB: loop body
LE: loop exit
PB: predicated region body
PF: predicated region fallthrough
CT: control target
= control target key end

     0   :  { %7 = vsyncpa [#allocation3], 0  ;;  %s685_s0 = inlined_call_operand.hbm [shape: f32[2,8,256], index: 0, kind: input, shape index: {}]   ;;  %s686_s1 = inlined_call_operand.vmem [shape: f32[1,4], index: 1, kind: input, shape index: {}]   ;;  %s687_s2 = inlined_call_operand.vmem [shape: f32[2,1,8,2], index: 2, kind: output, shape index: {}]  }
   0x1   :  { %9 = vsyncpa [#allocation3 + $0x1], 0  ;;  %s576_s9 = smov 0   ;;  %s578_s10 = smov 0  }
   0x2   :  { %s580_s11 = smov 0   ;;  %s582_s12 = smov 0  }
   0x3   :  { %s584_s13 = smov 0   ;;  %s586_s14 = smov 0  }
   0x4 LB: > { %s407_s15 = sadd.s32 4294967295, %s557_s14   ;;  %s27_s16 = sadd.s32 1, %s553_s13  ;;  %s557_s14 = sphi %s586_s14, %s15_s14   ;;  %s553_s13 = sphi %s584_s13, %s695_s13   ;;  %s549_s12 = sphi %s582_s12, %s694_s12   ;;  %s545_s11 = sphi %s580_s11, %s693_s11   ;;  %s541_s10 = sphi %s578_s10, %s692_s10   ;;  %s537_s9 = sphi %s576_s9, %s691_s9  }
   0x5   : > { %p29_p0 = scmp.ge.s32.totalorder %s27_s16, 2  ;;  %s36_s17 = sadd.s32 1, %s545_s11 }
   0x6   : > { %p43_p1 = scmp.ne.s32.totalorder %s545_s11, %s541_s10  ;;  %p44_p2 = scmp.eq.s32.totalorder %s557_s14, 0 }
   0x7   : > { %s697_s16 = smov (%p29_p0, %s27_s16), 0  ;;  %p49_p4 = scmp.ne.s32.totalorder %s541_s10, %s537_s9 }
   0x8   : > { %p612_p3 = por %p44_p2, %p43_p1  ;;  %s31_s19 = ssub.s32 %s553_s13, %s697_s16 }
   0x9   : > { %p50_p5 = scmp.eq.s32.totalorder %s407_s15, 0  ;;  %p34_p6 = scmp.eq.s32.totalorder %s31_s19, 0 }
   0xa   : > { %p429_p8 = scmp.lt.s32.totalorder %s557_s14, 2  ;;  %s125_s22 = sand.u32 1, %s545_s11  }
   0xb   : > { %p619_p7 = por %p50_p5, %p49_p4  ;;  %s422_s23 = sshll.u32 %s553_s13, 8 }
   0xc   : > { %s625_s21 = scalar_select %p34_p6, %s545_s11, %s36_s17  }
   0xd   : > { %s411_s24 = sshll.u32 %s125_s22, 4  ;;  %s137_s27 = scalar_lea.hbm %s685_s0, %s422_s23 }
   0xe   : > { %s129_s28 = scalar_lea.vmem [#allocation2], %s411_s24  ;;  %p634_p9 = pnand %p429_p8, %p612_p3 }
   0xf   : > { %s139_s29 = sshll.u32 %s129_s28, 4  ;;  %p414_p10 = scmp.ge.s32.totalorder %s557_s14, 1  ;;  %s140_s29 = int_to_ptr.vmem [resolvable:$true] %s139_s29 }
  0x10   : > { %p144_p11 = scmp.lt.s32.totalorder %s557_s14, 3  ;;  %s126_s3 = scalar_lea.sflag [#allocation3], %s125_s22 }
  0x11   : > { %p481_p12 = pneg %p634_p9  ;;  %s492_s4 = scalar_lea.vmem %s140_s29, 256 }
  0x12   : > { %p493_p13 = scmp.ne.s32.totalorder %s140_s29, %s492_s4  ;;  %s559_s5 = smov [#allocation2]  }
  0x13   : > { %s497_s6 = sshll.u32 %s559_s5, 4  ;;  %s498_s6 = int_to_ptr.vmem [resolvable:$false] %s497_s6 }
  0x14   : > { %p495_p0 = pnand %p493_p13, %p481_p12  ;;  %s499_s7 = scalar_lea.vmem %s498_s6, 512 }
  0x15   : > { %p500_p2 = scmp.lt.s32.totalorder %s140_s29, %s498_s6  ;;  %p501_p3 = scmp.lt.s32.totalorder %s499_s7, %s492_s4 }
  0x16   : > { %p496_p1 = pneg %p495_p0 }
  0x17   : > { %p502_p4 = por %p501_p3, %p500_p2 }
  0x19   : > { %p503_p5 = pnand %p502_p4, %p496_p1 }
  0x1b   : > { %506 = shalt.err (!%p503_p5)
}
  0x1c   : > { %428 = dma.hbm_to_vmem [thread:$0]  (!%p634_p9), %s137_s27, 256, %s140_s29, %s126_s3  }
  0x1d   : > { %p145_p6 = pnand %p414_p10, %p144_p11 }
  0x1e   : > { %s150_s8 = sand.u32 (!%p145_p6), 1, %s541_s10  }
  0x1f   : > { %148 = sbr.rel (%p145_p6) target bundleno = 395 (0x18b), region = 28  ;;  %s415_s9 = sshll.u32 (!%p145_p6), %s150_s8, 4 }
  0x20   : > { %s151_s15 = scalar_lea.sflag (!%p145_p6), [#allocation3], %s150_s8  ;;  %s154_s17 = scalar_lea.vmem (!%p145_p6), [#allocation2], %s415_s9 }
  0x24   : > { %532 = dma.done.wait (%p619_p7), %s151_s15, 256  }
  0x25   : > { %534 = vsyncadd (%p619_p7), %s151_s15, 4294967040  ;;  %v560_v0 = vmov 0.0   ;;  %vm192_vm0 = vcmask 1043456   ;;  %v186_v1 = vld [vmem:[%s154_s17 + $0x8] sm:$0xff]  ;;  %v185_v2 = vld [vmem:[%s154_s17] sm:$0xff]  ;;  %vm188_vm1 = vcmask 31744   ;;  %v278_v4 = vlaneseq }
  0x26   : > { %263 = vmatprep.mubr.f32.mxu0 %v560_v0  ;;  %v187_v3 = vld [vmem:[%s686_s1] sm:$0x1]  ;;  %417 = vmatprep.subr.msk.mxu0 %vm192_vm0, %v186_v1  ;;  %vm295_vm2 = vcmask 1047556   ;;  %v312_v22 = vmul.f32 %v185_v2, %v185_v2  ;;  %v313_v23 = vmul.f32 %v186_v1, %v186_v1  ;;  %p178_p7 = scmp.lt.s32.totalorder %s549_s12, 1  ;;  %vm293_vm3 = vcmask 3072  }
  0x27   : > { %418 = vmatpush1.msk.msra.mxu0 %vm192_vm0, %v185_v2  ;;  %v279_v7 = vshrl.u32 %v278_v4, 7  ;;  %v296_v24 = vsel %vm295_vm2, %v185_v2, 0.0  ;;  %v297_v28 = vsel %vm295_vm2, %v186_v1, 0.0  ;;  %vm310_vm4 = vcmask 11272  }
  0x28   : > { %419 = vmatmul.mubr.msk.f32.vlgmr.msra.gmra.mxu0 %vm188_vm1, %v187_v3  ;;  %v314_v32 = vsel %vm295_vm2, %v312_v22, 0.0  ;;  %v315_v33 = vsel %vm295_vm2, %v313_v23, 0.0  ;;  %v298_v35 = vadd.f32 %v297_v28, %v296_v24  ;;  %s699_s12 = smov (!%p178_p7, %s549_s12), 1  ;;  %vm301_vm5 = vcmask 7172  }
  0x29   : > { %v280_v12 = vsub.s32 0, %v279_v7  ;;  %v316_v36 = vadd.f32 %v315_v33, %v314_v32  ;;  %s416_s20 = sshll.u32 %s699_s12, 3  ;;  %vm319_vm6 = vcmask 15372  }
  0x2a   : > { %s184_s24 = scalar_lea.vmem %s687_s2, %s416_s20 }
  0xe8   : > { %v265_v5 = vpop.f32.mrf.mxu0 }
  0xe9   : > { %v270_v6 = vmul.f32 0.16666667, %v265_v5 }
  0xea   : > { %v267_v8 = vpop.f32.mrf.mxu0 }
  0xeb   : > { %v272_v9 = vadd.f32 0.5, %v270_v6  ;;  %v271_v10 = vmul.f32 0.16666667, %v267_v8 }
  0xed   : > { %v274_v11 = vmax.f32 %v272_v9, 0.0  ;;  %v273_v13 = vadd.f32 0.5, %v271_v10 }
  0xef   : > { %v276_v14 = vmin.f32 %v274_v11, 1.0  ;;  %v275_v15 = vmax.f32 %v273_v13, 0.0 }
  0xf1   : > { %v281_v16 = vrot.slane %v276_v14, %v280_v12  ;;  %v277_v17 = vmin.f32 %v275_v15, 1.0 }
  0xf3   : > { %v285_v18 = vrot.slane %v277_v17, %v280_v12  ;;  %v286_v19 = vmul.f32 %v281_v16, %v185_v2 }
  0xf5   : > { %v287_v20 = vmul.f32 %v285_v18, %v186_v1  ;;  %v303_v21 = vmul.f32 %v286_v19, %v286_v19  ;;  %v288_v25 = vsel %vm192_vm0, %v286_v19, 0.0 }
  0xf7   : > { %v289_v26 = vsel %vm192_vm0, %v287_v20, 0.0  ;;  %v304_v27 = vmul.f32 %v287_v20, %v287_v20  ;;  %v305_v30 = vsel %vm192_vm0, %v303_v21, 0.0 }
  0xf8   : > { %v290_v29 = vadd.f32 %v289_v26, %v288_v25 }
  0xf9   : > { %v306_v31 = vsel %vm192_vm0, %v304_v27, 0.0 }
  0xfa   : > { %291 = vadd.xlane.f32.xlu0 %v290_v29  ;;  %v307_v34 = vadd.f32 %v306_v31, %v305_v30 }
  0xfc   : > { %308 = vadd.xlane.f32.xlu1 %v307_v34 }
  0xfe   : > { %299 = vadd.xlane.f32.xlu0 %v298_v35 }
 0x100   : > { %317 = vadd.xlane.f32.xlu1 %v316_v36 }
 0x183   : > { %v292_v37 = vpop.xlane.xlu0 %291 }
 0x184   : > { %294 = vst.msk [vmem:[%s184_s24] sm:$0xf] %vm293_vm3, %v292_v37 }
 0x185   : > { %v309_v38 = vpop.xlane.xlu1 %308 }
 0x186   : > { %311 = vst.msk [vmem:[%s184_s24] sm:$0xf] %vm310_vm4, %v309_v38 }
 0x187   : > { %v300_v39 = vpop.xlane.xlu0 %299 }
 0x188   : > { %302 = vst.msk [vmem:[%s184_s24] sm:$0xf0] %vm301_vm5, %v300_v39 }
 0x189   : > { %v318_v40 = vpop.xlane.xlu1 %317 }
 0x18a   : > { %320 = vst.msk [vmem:[%s184_s24] sm:$0xf0] %vm319_vm6, %v318_v40 }
 0x18b PF: > { %s15_s14 = sadd.s32 1, %s557_s14   ;;  %s691_s9 = smov %s541_s10 }
 0x18c   : > { %p12_p8 = scmp.ge.s32.totalorder %s15_s14, 4   ;;  %s692_s10 = smov %s545_s11 }
 0x18d   : > { %s693_s11 = smov %s625_s21  ;;  %s694_s12 = smov %s553_s13 }
 0x18e   : > { %s695_s13 = smov %s697_s16  ;;  %14 = sbr.rel (!%p12_p8) target bundleno = 4 (0x4), region = 68 }
 0x193   :  { %346 = vsyncpa [#allocation3], 1 }
 0x194   :  { %348 = vsyncpa [#allocation3 + $0x1], 1 }

</bundles_post_ra>
